<compile_context>
chip_gen: v6e
topology: v6e:2x2x1
jax: 0.10.0
libtpu: 0.0.40
codegen_flags: <defaults>
</compile_context>

<pallas_src>
import functools

import jax
import jax.numpy as jnp
from jax import lax
from jax.experimental import pallas as pl
from jax.experimental.pallas import tpu as pltpu


def _focal_loss_kernel(logits_ref, labels_ref, sum_ref, cnt_ref,
                       acc_sum, acc_cnt, *, gamma, ignore_lb, hw, n_sp_inner):
    sp = pl.program_id(0)     # spatial split (keeps 2nd v7x TC busy when N==1)
    t = pl.program_id(2)      # spatial tile within the split ("arbitrary" axis)

    @pl.when(t == 0)
    def _():
        acc_sum[...] = jnp.zeros_like(acc_sum)
        acc_cnt[...] = jnp.zeros_like(acc_cnt)

    x = logits_ref[0].astype(jnp.float32)      # (C, TL)  classes x pixels
    lbl = labels_ref[0].astype(jnp.int32)      # (1, TL)
    C, TL = x.shape

    # Stable softmax pieces over the class (sublane) axis.  No sanitize of
    # out-of-bounds lanes: per-lane garbage can only poison its own lane and
    # is discarded with a where-select at accumulation time.
    m = jnp.max(x, axis=0, keepdims=True)      # (1, TL)
    z = x - m                                  # (C, TL)
    e = jnp.exp(z)                             # (C, TL)
    s = jnp.sum(e, axis=0, keepdims=True)      # (1, TL)
    logs = jnp.log(s)                          # (1, TL)

    # Gather z at each pixel's label row: compare + select + sublane reduce
    # (no one-hot cast/multiply).
    row = lax.broadcasted_iota(jnp.int32, (C, TL), 0)
    z_lbl = jnp.sum(jnp.where(row == lbl, z, 0.0), axis=0, keepdims=True)

    logp_lbl = z_lbl - logs                    # log_softmax[label]
    p_lbl = jnp.exp(logp_lbl)                  # softmax[label]
    one_minus_p = jnp.maximum(1.0 - p_lbl, 0.0)
    g = float(gamma)
    if g == 2.0:
        factor = one_minus_p * one_minus_p
    elif g == float(int(g)) and 0.0 <= g <= 4.0:
        factor = jnp.ones_like(one_minus_p)
        for _ in range(int(g)):
            factor = factor * one_minus_p
    else:
        factor = jnp.power(one_minus_p, g)

    contrib = -(factor * logp_lbl)             # (1, TL)

    valid = lbl != ignore_lb                   # (1, TL) bool
    if hw % TL != 0:
        # Partial last block: mask lanes past H*W.  This whole branch is
        # statically skipped when the spatial size divides the tile.
        lane = lax.broadcasted_iota(jnp.int32, (1, TL), 1)
        col = (sp * n_sp_inner + t) * TL + lane
        valid = jnp.logical_and(valid, col < hw)

    # where-masking (NOT multiplicative) so garbage OOB lanes can't inject NaN.
    acc_sum[...] += jnp.where(valid, contrib, 0.0)
    acc_cnt[...] += jnp.where(valid, 1.0, 0.0)

    @pl.when(t == pl.num_programs(2) - 1)
    def _():
        sum_ref[...] = jnp.full(sum_ref.shape, jnp.sum(acc_sum[...]),
                                dtype=jnp.float32)
        cnt_ref[...] = jnp.full(cnt_ref.shape, jnp.sum(acc_cnt[...]),
                                dtype=jnp.float32)


def softmax_focal_loss(logits, labels, *, gamma=2.0, ignore_lb=255,
                       tile_lanes=None):
    """logits: (N, C, H, W) float; labels: (N, H, W) int. Returns scalar loss."""
    N, C, H, W = logits.shape
    HW = H * W

    x = logits.reshape(N, C, HW)          # classes on sublanes, pixels on lanes
    # Keep labels in their native integer dtype (no host astype -> no extra
    # HBM pass); the kernel casts in-register.
    if jnp.issubdtype(labels.dtype, jnp.integer):
        y = labels.reshape(N, 1, HW)
    else:
        y = labels.reshape(N, 1, HW).astype(jnp.int32)

    # ---- per-generation VMEM budget (v7x has only 64 MiB per TensorCore) ----
    try:
        vmem_cap = int(pltpu.get_tpu_info().vmem_capacity_bytes)
    except Exception:
        vmem_cap = 64 * 1024 * 1024       # safe floor (v7x per-TC capacity)
    work_budget = min(vmem_cap // 6, 16 * 1024 * 1024)   # conservative working set
    vmem_limit = min(vmem_cap // 2, 64 * 1024 * 1024)    # explicit scoped limit

    # ---- spatial (lane) tile size: multiple of 128, budget-aware ----
    if tile_lanes is None:
        cp = -(-C // 8) * 8                              # sublane-padded class rows
        logit_bytes = jnp.dtype(logits.dtype).itemsize
        label_bytes = jnp.dtype(y.dtype).itemsize
        bytes_per_lane = (
            2 * cp * logit_bytes     # double-buffered logits block (native dtype)
            + 2 * 8 * label_bytes    # double-buffered labels block, 8-sublane padded
            + 5 * cp * 4             # f32 upcast + (C, tl) intermediates
            + 14 * 8 * 4             # (1, tl) f32 temps + 2 accumulators, 8-padded
        )
        tl = (work_budget // bytes_per_lane) // 128 * 128
    else:
        tl = (int(tile_lanes) // 128) * 128
    tl = max(128, tl)
    tl = min(tl, pl.cdiv(HW, 128) * 128)  # never wider than the lane-rounded image

    n_sp = pl.cdiv(HW, tl)

    # 2-way spatial split (leading "parallel" axis) for v7x's 2nd TensorCore.
    # Only when it divides evenly, so single-TC chips never fetch extra tiles.
    split = 2 if (n_sp >= 2 and n_sp % 2 == 0) else 1
    n_sp_inner = n_sp // split

    kernel = functools.partial(
        _focal_loss_kernel, gamma=float(gamma), ignore_lb=int(ignore_lb),
        hw=HW, n_sp_inner=n_sp_inner)

    def in_map(spl, n, t):
        return (n, 0, spl * n_sp_inner + t)

    def out_map(spl, n, t):
        return (spl, n, 0, 0)

    sums, cnts = pl.pallas_call(
        kernel,
        out_shape=(jax.ShapeDtypeStruct((split, N, 1, 128), jnp.float32),
                   jax.ShapeDtypeStruct((split, N, 1, 128), jnp.float32)),
        grid_spec=pltpu.PrefetchScalarGridSpec(
            num_scalar_prefetch=0,
            grid=(split, N, n_sp_inner),
            in_specs=[
                pl.BlockSpec((1, C, tl), in_map),
                pl.BlockSpec((1, 1, tl), in_map),
            ],
            out_specs=[
                pl.BlockSpec((1, 1, 1, 128), out_map),
                pl.BlockSpec((1, 1, 1, 128), out_map),
            ],
            scratch_shapes=[
                pltpu.VMEM((1, tl), jnp.float32),
                pltpu.VMEM((1, tl), jnp.float32),
            ],
        ),
        compiler_params=pltpu.CompilerParams(
            dimension_semantics=("parallel", "parallel", "arbitrary"),
            vmem_limit_bytes=int(vmem_limit),
        ),
    )(x, y)

    loss_sum = jnp.sum(sums[:, :, 0, 0])
    valid_cnt = jnp.sum(cnts[:, :, 0, 0])
    # NLLLoss(reduction='mean', ignore_index): mean over valid pixels.  The
    # max(cnt, 1) guard for the all-ignored case is an intentional deviation
    # from PyTorch's NaN.
    return loss_sum / jnp.maximum(valid_cnt, 1.0)


def _reference_loss(logits, labels, gamma, ignore_lb):
    # Pure-JAX reference of the PyTorch forward, for correctness checks.
    p = jax.nn.softmax(logits, axis=1)
    logp = jax.nn.log_softmax(logits, axis=1)
    w = jnp.power(1.0 - p, gamma) * logp
    lbl_safe = jnp.where(labels == ignore_lb, 0, labels)
    gathered = jnp.take_along_axis(w, lbl_safe[:, None, :, :], axis=1)[:, 0]
    valid = (labels != ignore_lb).astype(jnp.float32)
    return -jnp.sum(gathered * valid) / jnp.sum(valid)


if __name__ == "__main__":
    key = jax.random.PRNGKey(0)

    # Test 1: small NCHW, single spatial tile, gamma = 2.
    k1, k2, k3, key = jax.random.split(key, 4)
    N, C, H, W = 2, 4, 16, 16
    logits = jax.random.normal(k1, (N, C, H, W), dtype=jnp.float32)
    labels = jax.random.randint(k2, (N, H, W), 0, C, dtype=jnp.int32)
    labels = jnp.where(jax.random.uniform(k3, (N, H, W)) < 0.1, 255, labels)
    out = jax.block_until_ready(
        softmax_focal_loss(logits, labels, gamma=2.0, ignore_lb=255))
    ref = _reference_loss(logits, labels, 2.0, 255)
    assert jnp.allclose(out, ref, rtol=1e-4, atol=1e-5), (out, ref)

    # Test 2: multi-tile + 2-way spatial split + partial tail block
    # (HW = 400 is not a multiple of 128), single batch, non-integer gamma.
    k1, k2, k3, key = jax.random.split(key, 4)
    N, C, H, W = 1, 6, 20, 20
    logits = jax.random.normal(k1, (N, C, H, W), dtype=jnp.float32)
    labels = jax.random.randint(k2, (N, H, W), 0, C, dtype=jnp.int32)
    labels = jnp.where(jax.random.uniform(k3, (N, H, W)) < 0.15, 255, labels)
    out = jax.block_until_ready(
        softmax_focal_loss(logits, labels, gamma=1.5, ignore_lb=255,
                           tile_lanes=128))
    ref = _reference_loss(logits, labels, 1.5, 255)
    assert jnp.allclose(out, ref, rtol=1e-4, atol=1e-5), (out, ref)

    print("KERNEL_OK")
</pallas_src>

<mosaic_0001>
module attributes {stable_mosaic.version = 11 : i64} {
  func.func @_focal_loss_kernel(%arg0: i32, %arg1: i32, %arg2: i32, %arg3: memref<1x4x256xf32, #tpu.memory_space<vmem>>, %arg4: memref<1x1x256xi32, #tpu.memory_space<vmem>>, %arg5: memref<1x1x1x128xf32, #tpu.memory_space<vmem>>, %arg6: memref<1x1x1x128xf32, #tpu.memory_space<vmem>>, %arg7: memref<1x256xf32, #tpu.memory_space<vmem>>, %arg8: memref<1x256xf32, #tpu.memory_space<vmem>>) attributes {dimension_semantics = [#tpu.dimension_semantics<parallel>, #tpu.dimension_semantics<parallel>, #tpu.dimension_semantics<arbitrary>], iteration_bounds = array<i64: 1, 2, 1>, scalar_prefetch = 0 : i64, scratch_operands = 2 : i64, tpu.core_type = #tpu.core_type<tc>, window_params = [{transform_indices = @transform_0, window_bounds = array<i64: 1, 4, 256>}, {transform_indices = @transform_1, window_bounds = array<i64: 1, 1, 256>}, {transform_indices = @transform_2, window_bounds = array<i64: 1, 1, 1, 128>}, {transform_indices = @transform_3, window_bounds = array<i64: 1, 1, 1, 128>}]} {
    %c0_i32 = arith.constant 0 : i32
    %0 = arith.cmpi eq, %arg2, %c0_i32 : i32
    %1 = arith.extui %0 : i1 to i32
    %c0_i32_0 = arith.constant 0 : i32
    %2 = arith.cmpi ne, %1, %c0_i32_0 : i32
    scf.if %2 {
      %cst_25 = arith.constant 0.000000e+00 : f32
      %48 = vector.broadcast %cst_25 : f32 to vector<1x256xf32>
      %c0_26 = arith.constant 0 : index
      %c0_27 = arith.constant 0 : index
      %49 = vector.load %arg7[%c0_26, %c0_27] : memref<1x256xf32, #tpu.memory_space<vmem>>, vector<1x256xf32>
      tpu.vector_store %arg7[%c0_26, %c0_27], %48 {strides = array<i32>} : memref<1x256xf32, #tpu.memory_space<vmem>>, vector<1x256xf32>,
      %cst_28 = arith.constant 0.000000e+00 : f32
      %50 = vector.broadcast %cst_28 : f32 to vector<1x256xf32>
      %c0_29 = arith.constant 0 : index
      %c0_30 = arith.constant 0 : index
      %51 = vector.load %arg8[%c0_29, %c0_30] : memref<1x256xf32, #tpu.memory_space<vmem>>, vector<1x256xf32>
      tpu.vector_store %arg8[%c0_29, %c0_30], %50 {strides = array<i32>} : memref<1x256xf32, #tpu.memory_space<vmem>>, vector<1x256xf32>,
    } else {
    }
    %c0 = arith.constant 0 : index
    %c0_1 = arith.constant 0 : index
    %c0_2 = arith.constant 0 : index
    %3 = vector.load %arg3[%c0, %c0_1, %c0_2] : memref<1x4x256xf32, #tpu.memory_space<vmem>>, vector<1x4x256xf32>
    %4 = vector.shape_cast %3 : vector<1x4x256xf32> to vector<4x256xf32>
    %c0_3 = arith.constant 0 : index
    %c0_4 = arith.constant 0 : index
    %c0_5 = arith.constant 0 : index
    %5 = vector.load %arg4[%c0_3, %c0_4, %c0_5] : memref<1x1x256xi32, #tpu.memory_space<vmem>>, vector<1x1x256xi32>
    %6 = vector.shape_cast %5 : vector<1x1x256xi32> to vector<1x256xi32>
    %cst = arith.constant dense<0xFF800000> : vector<256xf32>
    %7 = vector.multi_reduction <maximumf>, %4, %cst [0] : vector<4x256xf32> to vector<256xf32>
    %8 = vector.shape_cast %7 : vector<256xf32> to vector<1x256xf32>
    %9 = vector.broadcast %8 : vector<1x256xf32> to vector<4x256xf32>
    %10 = arith.subf %4, %9 : vector<4x256xf32>
    %11 = math.exp %10 : vector<4x256xf32>
    %cst_6 = arith.constant dense<0.000000e+00> : vector<256xf32>
    %12 = vector.multi_reduction <add>, %11, %cst_6 [0] : vector<4x256xf32> to vector<256xf32>
    %13 = vector.shape_cast %12 : vector<256xf32> to vector<1x256xf32>
    %14 = math.log %13 : vector<1x256xf32>
    %15 = tpu.iota {dimensions = array<i32: 0>} : vector<4x256xi32>
    %16 = vector.broadcast %6 : vector<1x256xi32> to vector<4x256xi32>
    %17 = arith.cmpi eq, %15, %16 : vector<4x256xi32>
    %cst_7 = arith.constant 0.000000e+00 : f32
    %18 = vector.broadcast %cst_7 : f32 to vector<4x256xf32>
    %19 = arith.select %17, %10, %18 : vector<4x256xi1>, vector<4x256xf32>
    %cst_8 = arith.constant dense<0.000000e+00> : vector<256xf32>
    %20 = vector.multi_reduction <add>, %19, %cst_8 [0] : vector<4x256xf32> to vector<256xf32>
    %21 = vector.shape_cast %20 : vector<256xf32> to vector<1x256xf32>
    %22 = arith.subf %21, %14 : vector<1x256xf32>
    %23 = math.exp %22 : vector<1x256xf32>
    %cst_9 = arith.constant 1.000000e+00 : f32
    %24 = vector.broadcast %cst_9 : f32 to vector<1x256xf32>
    %25 = arith.subf %24, %23 : vector<1x256xf32>
    %cst_10 = arith.constant 0.000000e+00 : f32
    %26 = vector.broadcast %cst_10 : f32 to vector<1x256xf32>
    %27 = arith.maximumf %25, %26 : vector<1x256xf32>
    %28 = arith.mulf %27, %27 : vector<1x256xf32>
    %29 = arith.mulf %28, %22 : vector<1x256xf32>
    %cst_11 = arith.constant 0.000000e+00 : f32
    %30 = vector.broadcast %cst_11 : f32 to vector<1x256xf32>
    %31 = arith.subf %30, %29 : vector<1x256xf32>
    %c255_i32 = arith.constant 255 : i32
    %32 = vector.broadcast %c255_i32 : i32 to vector<1x256xi32>
    %33 = arith.cmpi ne, %6, %32 : vector<1x256xi32>
    %c0_12 = arith.constant 0 : index
    %c0_13 = arith.constant 0 : index
    %34 = vector.load %arg7[%c0_12, %c0_13] : memref<1x256xf32, #tpu.memory_space<vmem>>, vector<1x256xf32>
    %cst_14 = arith.constant 0.000000e+00 : f32
    %35 = vector.broadcast %cst_14 : f32 to vector<1x256xf32>
    %36 = arith.select %33, %31, %35 : vector<1x256xi1>, vector<1x256xf32>
    %37 = arith.addf %34, %36 : vector<1x256xf32>
    %c0_15 = arith.constant 0 : index
    %c0_16 = arith.constant 0 : index
    %38 = vector.load %arg7[%c0_15, %c0_16] : memref<1x256xf32, #tpu.memory_space<vmem>>, vector<1x256xf32>
    tpu.vector_store %arg7[%c0_15, %c0_16], %37 {strides = array<i32>} : memref<1x256xf32, #tpu.memory_space<vmem>>, vector<1x256xf32>,
    %c0_17 = arith.constant 0 : index
    %c0_18 = arith.constant 0 : index
    %39 = vector.load %arg8[%c0_17, %c0_18] : memref<1x256xf32, #tpu.memory_space<vmem>>, vector<1x256xf32>
    %cst_19 = arith.constant 1.000000e+00 : f32
    %cst_20 = arith.constant 0.000000e+00 : f32
    %40 = vector.broadcast %cst_19 : f32 to vector<1x256xf32>
    %41 = vector.broadcast %cst_20 : f32 to vector<1x256xf32>
    %42 = arith.select %33, %40, %41 : vector<1x256xi1>, vector<1x256xf32>
    %43 = arith.addf %39, %42 : vector<1x256xf32>
    %c0_21 = arith.constant 0 : index
    %c0_22 = arith.constant 0 : index
    %44 = vector.load %arg8[%c0_21, %c0_22] : memref<1x256xf32, #tpu.memory_space<vmem>>, vector<1x256xf32>
    tpu.vector_store %arg8[%c0_21, %c0_22], %43 {strides = array<i32>} : memref<1x256xf32, #tpu.memory_space<vmem>>, vector<1x256xf32>,
    %c0_i32_23 = arith.constant 0 : i32
    %45 = arith.cmpi eq, %arg2, %c0_i32_23 : i32
    %46 = arith.extui %45 : i1 to i32
    %c0_i32_24 = arith.constant 0 : i32
    %47 = arith.cmpi ne, %46, %c0_i32_24 : i32
    scf.if %47 {
      %c0_25 = arith.constant 0 : index
      %c0_26 = arith.constant 0 : index
      %48 = vector.load %arg7[%c0_25, %c0_26] : memref<1x256xf32, #tpu.memory_space<vmem>>, vector<1x256xf32>
      %49 = vector.shape_cast %48 : vector<1x256xf32> to vector<1x1x256xf32>
      %cst_27 = arith.constant dense<0.000000e+00> : vector<1xf32>
      %50 = vector.multi_reduction <add>, %49, %cst_27 [1, 2] : vector<1x1x256xf32> to vector<1xf32>
      %51 = vector.shape_cast %50 : vector<1xf32> to vector<1x1x1xf32>
      %52 = vector.extract %51[0, 0, 0] : f32 from vector<1x1x1xf32>
      %53 = vector.broadcast %52 : f32 to vector<1x1x1x128xf32>
      %c0_28 = arith.constant 0 : index
      %c0_29 = arith.constant 0 : index
      %c0_30 = arith.constant 0 : index
      %c0_31 = arith.constant 0 : index
      %54 = vector.load %arg5[%c0_28, %c0_29, %c0_30, %c0_31] : memref<1x1x1x128xf32, #tpu.memory_space<vmem>>, vector<1x1x1x128xf32>
      tpu.vector_store %arg5[%c0_28, %c0_29, %c0_30, %c0_31], %53 {strides = array<i32>} : memref<1x1x1x128xf32, #tpu.memory_space<vmem>>, vector<1x1x1x128xf32>,
      %c0_32 = arith.constant 0 : index
      %c0_33 = arith.constant 0 : index
      %55 = vector.load %arg8[%c0_32, %c0_33] : memref<1x256xf32, #tpu.memory_space<vmem>>, vector<1x256xf32>
      %56 = vector.shape_cast %55 : vector<1x256xf32> to vector<1x1x256xf32>
      %cst_34 = arith.constant dense<0.000000e+00> : vector<1xf32>
      %57 = vector.multi_reduction <add>, %56, %cst_34 [1, 2] : vector<1x1x256xf32> to vector<1xf32>
      %58 = vector.shape_cast %57 : vector<1xf32> to vector<1x1x1xf32>
      %59 = vector.extract %58[0, 0, 0] : f32 from vector<1x1x1xf32>
      %60 = vector.broadcast %59 : f32 to vector<1x1x1x128xf32>
      %c0_35 = arith.constant 0 : index
      %c0_36 = arith.constant 0 : index
      %c0_37 = arith.constant 0 : index
      %c0_38 = arith.constant 0 : index
      %61 = vector.load %arg6[%c0_35, %c0_36, %c0_37, %c0_38] : memref<1x1x1x128xf32, #tpu.memory_space<vmem>>, vector<1x1x1x128xf32>
      tpu.vector_store %arg6[%c0_35, %c0_36, %c0_37, %c0_38], %60 {strides = array<i32>} : memref<1x1x1x128xf32, #tpu.memory_space<vmem>>, vector<1x1x1x128xf32>,
    } else {
    }
    return
  }
  func.func @transform_0(%arg0: i32, %arg1: i32, %arg2: i32) -> (i32, i32, i32) {
    %c1_i32 = arith.constant 1 : i32
    %0 = arith.muli %arg0, %c1_i32 : i32
    %1 = arith.addi %0, %arg2 : i32
    %c0_i32 = arith.constant 0 : i32
    %c0_i32_0 = arith.constant 0 : i32
    return %arg1, %c0_i32, %1 : i32, i32, i32
  }
  func.func @transform_1(%arg0: i32, %arg1: i32, %arg2: i32) -> (i32, i32, i32) {
    %c1_i32 = arith.constant 1 : i32
    %0 = arith.muli %arg0, %c1_i32 : i32
    %1 = arith.addi %0, %arg2 : i32
    %c0_i32 = arith.constant 0 : i32
    %c0_i32_0 = arith.constant 0 : i32
    return %arg1, %c0_i32, %1 : i32, i32, i32
  }
  func.func @transform_2(%arg0: i32, %arg1: i32, %arg2: i32) -> (i32, i32, i32, i32) {
    %c0_i32 = arith.constant 0 : i32
    %c0_i32_0 = arith.constant 0 : i32
    %c0_i32_1 = arith.constant 0 : i32
    return %arg0, %arg1, %c0_i32, %c0_i32_0 : i32, i32, i32, i32
  }
  func.func @transform_3(%arg0: i32, %arg1: i32, %arg2: i32) -> (i32, i32, i32, i32) {
    %c0_i32 = arith.constant 0 : i32
    %c0_i32_0 = arith.constant 0 : i32
    %c0_i32_1 = arith.constant 0 : i32
    return %arg0, %arg1, %c0_i32, %c0_i32_0 : i32, i32, i32, i32
  }
}

</mosaic_0001>

<bundles_post_ra>
// kernel: tpu_custom_call.1
= control target key start
LH: loop header
LB: loop body
LE: loop exit
PB: predicated region body
PF: predicated region fallthrough
CT: control target
= control target key end

     0   :  { %9 = vsyncpa [#allocation5], 0  ;;  %s1199_s0 = inlined_call_operand.hbm [shape: f32[2,4,256], index: 0, kind: input, shape index: {}]   ;;  %s1200_s1 = inlined_call_operand.hbm [shape: s32[2,1,256], index: 1, kind: input, shape index: {}]   ;;  %s1201_s2 = inlined_call_operand.hbm [shape: f32[1,2,1,128], index: 2, kind: output, shape index: {0}]   ;;  %s1202_s3 = inlined_call_operand.hbm [shape: f32[1,2,1,128], index: 3, kind: output, shape index: {1}]  }
   0x1   :  { %11 = vsyncpa [#allocation5 + $0x1], 0 }
   0x2   :  { %12 = vsyncpa [#allocation8], 0 }
   0x3   :  { %14 = vsyncpa [#allocation8 + $0x1], 0 }
   0x4   :  { %15 = vsyncpa [#allocation6], 0 }
   0x5   :  { %17 = vsyncpa [#allocation6 + $0x1], 0 }
   0x6   :  { %18 = vsyncpa [#allocation11], 0 }
   0x7   :  { %20 = vsyncpa [#allocation11 + $0x1], 0  ;;  %s947_s12 = smov 0   ;;  %s949_s13 = smov 0  }
   0x8   :  { %s951_s14 = smov 0   ;;  %s953_s15 = smov 0  }
   0x9   :  { %s955_s16 = smov 0   ;;  %s957_s17 = smov 0  }
   0xa LB: > { %s641_s18 = sadd.s32 4294967295, %s919_s17   ;;  %s642_s19 = sadd.s32 4294967294, %s919_s17   ;;  %s919_s17 = sphi %s957_s17, %s26_s17   ;;  %s915_s16 = sphi %s955_s16, %s1216_s16   ;;  %s911_s15 = sphi %s953_s15, %s1215_s15   ;;  %s907_s14 = sphi %s951_s14, %s1214_s14   ;;  %s903_s13 = sphi %s949_s13, %s1213_s13   ;;  %s899_s12 = sphi %s947_s12, %s1212_s12  }
   0xb   : > { %s41_s20 = sadd.s32 1, %s915_s16  ;;  %s56_s21 = sadd.s32 1, %s907_s14 }
   0xc   : > { %p43_p0 = scmp.ge.s32.totalorder %s41_s20, 2  ;;  %p63_p1 = scmp.ne.s32.totalorder %s907_s14, %s903_s13 }
   0xd   : > { %p64_p2 = scmp.eq.s32.totalorder %s919_s17, 0  ;;  %p69_p3 = scmp.ne.s32.totalorder %s903_s13, %s899_s12 }
   0xe   : > { %s1218_s20 = smov (%p43_p0, %s41_s20), 0  ;;  %p70_p5 = scmp.eq.s32.totalorder %s641_s18, 0 }
   0xf   : > { %p988_p4 = por %p64_p2, %p63_p1  ;;  %s51_s23 = ssub.s32 %s915_s16, %s1218_s20 }
  0x10   : > { %p125_p6 = scmp.eq.s32.totalorder %s641_s18, 1  ;;  %p54_p7 = scmp.eq.s32.totalorder %s51_s23, 0 }
  0x11   : > { %p994_p8 = por %p70_p5, %p69_p3  ;;  %p131_p10 = scmp.eq.s32.totalorder %s642_s19, 1 }
  0x12   : > { %p998_p9 = por %p125_p6, %p63_p1  ;;  %p686_p13 = scmp.lt.s32.totalorder %s919_s17, 2 }
  0x13   : > { %s1003_s26 = scalar_select %p54_p7, %s907_s14, %s56_s21  }
  0x14   : > { %p1005_p11 = por %p131_p10, %p69_p3  ;;  %s1012_s28 = sand.u32 1, %s907_s14  }
  0x15   : > { %s645_s29 = sshll.u32 %s1012_s28, 3  ;;  %s658_s30 = sshll.u32 %s915_s16, 7 }
  0x16   : > { %s192_s6 = scalar_lea.hbm %s1199_s0, %s658_s30  ;;  %s183_s7 = scalar_lea.vmem [#allocation4], %s645_s29 }
  0x17   : > { %s194_s8 = sshll.u32 %s183_s7, 4  ;;  %p1021_p0 = pnand %p686_p13, %p988_p4  ;;  %s195_s8 = int_to_ptr.vmem [resolvable:$true] %s194_s8 }
  0x18   : > { %p651_p1 = scmp.ge.s32.totalorder %s919_s17, 1  ;;  %p221_p2 = scmp.lt.s32.totalorder %s919_s17, 3 }
  0x19   : > { %s180_s10 = scalar_lea.sflag [#allocation5], %s1012_s28  ;;  %p751_p3 = pneg %p1021_p0 }
  0x1a   : > { %s762_s11 = scalar_lea.vmem %s195_s8, 128  ;;  %s921_s18 = smov [#allocation4]  }
  0x1b   : > { %p763_p5 = scmp.ne.s32.totalorder %s195_s8, %s762_s11  ;;  %s767_s19 = sshll.u32 %s921_s18, 4  ;;  %s768_s19 = int_to_ptr.vmem [resolvable:$false] %s767_s19 }
  0x1c   : > { %s769_s21 = scalar_lea.vmem %s768_s19, 256  ;;  %p770_p4 = scmp.lt.s32.totalorder %s195_s8, %s768_s19 }
  0x1d   : > { %p765_p6 = pnand %p763_p5, %p751_p3  ;;  %p771_p10 = scmp.lt.s32.totalorder %s769_s21, %s762_s11 }
  0x1f   : > { %p766_p7 = pneg %p765_p6  ;;  %p772_p13 = por %p771_p10, %p770_p4 }
  0x21   : > { %p773_p12 = pnand %p772_p13, %p766_p7 }
  0x23   : > { %776 = shalt.err (!%p773_p12)
}
  0x24   : > { %675 = dma.hbm_to_vmem [thread:$0]  (!%p1021_p0), %s192_s6, 128, %s195_s8, %s180_s10  }
  0x25   : > { %p1039_p5 = pnand %p651_p1, %p221_p2  ;;  %s648_s23 = sshll.u32 %s1012_s28, 1 }
  0x26   : > { %s659_s29 = sshll.u32 %s915_s16, 5  ;;  %s205_s7 = scalar_lea.vmem [#allocation7], %s648_s23 }
  0x27   : > { %s214_s5 = scalar_lea.hbm %s1200_s1, %s659_s29  ;;  %s216_s11 = sshll.u32 %s205_s7, 4  ;;  %s217_s11 = int_to_ptr.vmem [resolvable:$true] %s216_s11 }
  0x28   : > { %s202_s18 = scalar_lea.sflag [#allocation8], %s1012_s28  ;;  %s790_s19 = scalar_lea.vmem %s217_s11, 32 }
  0x29   : > { %p791_p12 = scmp.ne.s32.totalorder %s217_s11, %s790_s19  ;;  %s922_s6 = smov [#allocation7]  }
  0x2a   : > { %s795_s8 = sshll.u32 %s922_s6, 4  ;;  %s796_s8 = int_to_ptr.vmem [resolvable:$false] %s795_s8 }
  0x2b   : > { %p793_p6 = pnand %p791_p12, %p751_p3  ;;  %s797_s10 = scalar_lea.vmem %s796_s8, 64 }
  0x2c   : > { %p798_p1 = scmp.lt.s32.totalorder %s217_s11, %s796_s8  ;;  %p799_p2 = scmp.lt.s32.totalorder %s797_s10, %s790_s19 }
  0x2d   : > { %p794_p7 = pneg %p793_p6 }
  0x2e   : > { %p800_p4 = por %p799_p2, %p798_p1 }
  0x30   : > { %p801_p10 = pnand %p800_p4, %p794_p7 }
  0x32   : > { %804 = shalt.err (!%p801_p10)
}
  0x33   : > { %678 = dma.hbm_to_vmem [thread:$0]  (!%p1021_p0), %s214_s5, 32, %s217_s11, %s202_s18  }
  0x34   : > { %225 = sbr.rel (%p1039_p5) target bundleno = 415 (0x19f), region = 28  ;;  %s1057_s28 = sand.u32 (!%p1039_p5), 1, %s903_s13  }
  0x35   : > { %s652_s21 = sshll.u32 (!%p1039_p5), %s1057_s28, 3  ;;  %s228_s23 = scalar_lea.sflag (!%p1039_p5), [#allocation5], %s1057_s28 }
  0x36   : > { %s231_s29 = scalar_lea.vmem (!%p1039_p5), [#allocation4], %s652_s21 }
  0x39   : > { %882 = dma.done.wait (%p994_p8), %s228_s23, 128  }
  0x3a   : > { %884 = vsyncadd (%p994_p8), %s228_s23, 4294967168  ;;  %s653_s9 = sshll.u32 %s1057_s28, 1  ;;  %s237_s22 = scalar_lea.sflag [#allocation8], %s1057_s28 }
  0x3b   : > { %s240_s30 = scalar_lea.vmem [#allocation7], %s653_s9 }
  0x3c   : > { %886 = dma.done.wait (%p994_p8), %s237_s22, 32  }
  0x3d   : > { %888 = vsyncadd (%p994_p8), %s237_s22, 4294967264  ;;  %v279_v0 = vlaneseq  ;;  %v923_v2 = vmov 0.0   ;;  %vm290_vm1 = vcmask 1043456   ;;  %v285_v3 = vld [vmem:[%s231_s29] sm:$0xff]  ;;  %v1079_v4 = vld [vmem:[%s240_s30] sm:$0x3] }
  0x3e   : > { %v288_v5 = vcombine.high %v285_v3, %v285_v3  ;;  %v291_v6 = vsel %vm290_vm1, %v285_v3, -inf  ;;  %vm380_vm2 = vcmp.ne.s32.totalorder %v1079_v4, 255  ;;  %vm426_vm5 = vcmask 1040384   ;;  %s654_s24 = sshll.u32 %s911_s15, 4  ;;  %s264_s4 = scalar_lea.vmem [#allocation9], %s1057_s28 }
  0x3f   : > { %vm1071_vm0 = vcmp.lt.s32.totalorder %v279_v0, 256  ;;  %v292_v7 = vrot.slane %v291_v6, 4  ;;  %v408_v10 = vsel %vm380_vm2, 1.0, %v923_v2  ;;  %v1088_v26 = vshrl.u32 %v279_v0, 7  ;;  %s486_s5 = sshll.u32 %s264_s4, 4  ;;  %s270_s7 = scalar_lea.vmem [#allocation10], %s1057_s28  ;;  %s1127_s5 = int_to_ptr.vmem [resolvable:$true] %s486_s5 }
  0x40   : > { %283 = vst.msk [vmem:[#allocation2] sm:$0x3] %vm1071_vm0, %v923_v2  ;;  %284 = vst.msk [vmem:[#allocation3] sm:$0x3] %vm1071_vm0, %v923_v2  ;;  %v298_v8 = vsel %vm290_vm1, %v288_v5, -inf  ;;  %s501_s11 = sshll.u32 %s270_s7, 4  ;;  %s1125_s6 = scalar_lea.hbm %s1201_s2, %s654_s24  ;;  %s1129_s11 = int_to_ptr.vmem [resolvable:$true] %s501_s11 }
  0x41   : > { %v293_v11 = vmax.f32 %v291_v6, %v292_v7  ;;  %v299_v12 = vrot.slane %v298_v8, 4  ;;  %v1091_v27 = vsub.s32 0, %v1088_v26  ;;  %v1094_v28 = vsub.s32 1, %v1088_v26  ;;  %s468_s10 = scalar_lea.sflag [#allocation6], %s1057_s28  ;;  %s805_s21 = scalar_lea.vmem %s1127_s5, 16 }
  0x42   : > { %p806_p8 = scmp.ne.s32.totalorder %s1127_s5, %s805_s21  ;;  %s925_s23 = smov [#allocation9]  }
  0x43   : > { %v294_v14 = vrot.slane %v293_v11, 2  ;;  %v300_v15 = vmax.f32 %v298_v8, %v299_v12  ;;  %v338_v29 = vrot.slane %v1079_v4, %v1091_v27  ;;  %v342_v30 = vrot.slane %v1079_v4, %v1094_v28  ;;  %s809_s29 = sshll.u32 %s925_s23, 4  ;;  %s810_s29 = int_to_ptr.vmem [resolvable:$false] %s809_s29 }
  0x44   : > { %p807_p0 = pnand %p806_p8, %p998_p9  ;;  %s811_s9 = scalar_lea.vmem %s810_s29, 32 }
  0x45   : > { %v295_v16 = vmax.f32 %v293_v11, %v294_v14  ;;  %v301_v17 = vrot.slane %v300_v15, 2  ;;  %vm343_vm3 = vcmp.eq.s32.totalorder %v1088_v26, %v338_v29  ;;  %vm344_vm4 = vcmp.eq.s32.totalorder %v1088_v26, %v342_v30  ;;  %p812_p13 = scmp.lt.s32.totalorder %s1127_s5, %s810_s29  ;;  %p813_p5 = scmp.lt.s32.totalorder %s811_s9, %s805_s21 }
  0x46   : > { %p808_p3 = pneg %p807_p0 }
  0x47   : > { %v407_v9 = vld [vmem:[#allocation3] sm:$0x3]  ;;  %v296_v18 = vrot.slane %v295_v16, 1  ;;  %v302_v19 = vmax.f32 %v300_v15, %v301_v17  ;;  %v924_v15 = vmov 1966171168   ;;  %p814_p12 = por %p813_p5, %p812_p13 }
  0x48   : > { %v409_v13 = vadd.f32 %v408_v10, %v407_v9 }
  0x49   : > { %v297_v20 = vmax.f32 %v295_v16, %v296_v18  ;;  %v303_v21 = vrot.slane %v302_v19, 1  ;;  %v386_v16 = vunpack.c.l.s4 %v924_v15  ;;  %p815_p6 = pnand %p814_p12, %p808_p3 }
  0x4a   : > { %410 = vst.msk [vmem:[#allocation3] sm:$0x3] %vm1071_vm0, %v409_v13 }
  0x4b   : > { %v304_v22 = vmax.f32 %v302_v19, %v303_v21  ;;  %v387_v21 = vunpack.c.0.s8 %v386_v16 }
  0x4d   : > { %v307_v23 = vcombine.low %v297_v20, %v304_v22 }
  0x4f   : > { %v309_v24 = vsub.f32 %v285_v3, %v307_v23 }
  0x51   : > { %v310_v25 = vmul.f32 1.442695, %v309_v24  ;;  %v346_v31 = vcombine.high %v309_v24, %v309_v24  ;;  %v348_v33 = vsel %vm343_vm3, %v309_v24, 0.0 }
  0x52   : > { %v350_v39 = vsel %vm290_vm1, %v348_v33, 0.0 }
  0x53   : > { %739 = vpow2.f32 %v310_v25  ;;  %v349_v37 = vsel %vm344_vm4, %v346_v31, 0.0  ;;  %v351_v45 = vrot.slane %v350_v39, 4  ;;  %v390_v25 = vsub.s32 %v387_v21, %v1088_v26  ;;  %v381_v31 = vld [vmem:[#allocation2] sm:$0x3] }
  0x54   : > { %v357_v42 = vsel %vm290_vm1, %v349_v37, 0.0 }
  0x55   : > { %v358_v48 = vrot.slane %v357_v42, 4  ;;  %v352_v51 = vadd.f32 %v351_v45, %v350_v39 }
  0x57   : > { %v359_v54 = vadd.f32 %v358_v48, %v357_v42  ;;  %v353_v56 = vrot.slane %v352_v51, 2 }
  0x59   : > { %v360_v57 = vrot.slane %v359_v54, 2  ;;  %v354_v58 = vadd.f32 %v353_v56, %v352_v51 }
  0x5b   : > { %v361_v59 = vadd.f32 %v360_v57, %v359_v54  ;;  %v355_v60 = vrot.slane %v354_v58, 1 }
  0x5d   : > { %v362_v61 = vrot.slane %v361_v59, 1  ;;  %v356_v62 = vadd.f32 %v355_v60, %v354_v58 }
  0x5f   : > { %v363_v2 = vadd.f32 %v362_v61, %v361_v59 }
  0x60   : > { %v740_v32 = vpop.eup %739 }
  0x61   : > { %v313_v34 = vcombine.high %v740_v32, %v740_v32  ;;  %v315_v35 = vsel %vm290_vm1, %v740_v32, 0.0 }
  0x62   : > { %v316_v36 = vrot.slane %v315_v35, 4 }
  0x63   : > { %v322_v38 = vsel %vm290_vm1, %v313_v34, 0.0 }
  0x64   : > { %v317_v40 = vadd.f32 %v316_v36, %v315_v35  ;;  %v323_v41 = vrot.slane %v322_v38, 4  ;;  %v441_v35 = vld [vmem:[#allocation3] sm:$0x3] }
  0x65   : > { %v446_v36 = vrot.slane %v441_v35, %v1091_v27  ;;  %v450_v37 = vrot.slane %v441_v35, %v1094_v28 }
  0x66   : > { %v318_v43 = vrot.slane %v317_v40, 2  ;;  %v324_v44 = vadd.f32 %v323_v41, %v322_v38 }
  0x67   : > { %v453_v42 = vsel %vm426_vm5, %v446_v36, 0.0  ;;  %v454_v4 = vsel %vm426_vm5, %v450_v37, 0.0 }
  0x68   : > { %v319_v46 = vadd.f32 %v318_v43, %v317_v40  ;;  %v325_v47 = vrot.slane %v324_v44, 2 }
  0x6a   : > { %v320_v49 = vrot.slane %v319_v46, 1  ;;  %v326_v50 = vadd.f32 %v325_v47, %v324_v44  ;;  %v455_v44 = vadd.f32 %v454_v4, %v453_v42 }
  0x6c   : > { %v321_v52 = vadd.f32 %v320_v49, %v319_v46  ;;  %v327_v53 = vrot.slane %v326_v50, 1 }
  0x6e   : > { %v328_v55 = vadd.f32 %v327_v53, %v326_v50  ;;  %741 = vlog2.f32 %v321_v52 }
  0x70   : > { %743 = vlog2.f32 %v328_v55 }
  0x7b   : > { %v742_v63 = vpop.eup %741 }
  0x7c   : > { %v330_v0 = vmul.f32 0.6931472, %v742_v63 }
  0x7d   : > { %v744_v3 = vpop.eup %743 }
  0x7e   : > { %v332_v5 = vmul.f32 0.6931472, %v744_v3  ;;  %v364_v6 = vsub.f32 %v356_v62, %v330_v0 }
  0x80   : > { %v365_v7 = vsub.f32 %v363_v2, %v332_v5  ;;  %v366_v8 = vmul.f32 1.442695, %v364_v6 }
  0x82   : > { %745 = vpow2.f32 %v366_v8  ;;  %v368_v9 = vmul.f32 1.442695, %v365_v7 }
  0x84   : > { %747 = vpow2.f32 %v368_v9 }
  0x8f   : > { %v746_v10 = vpop.eup %745 }
  0x90   : > { %v370_v11 = vsub.f32 1.0, %v746_v10 }
  0x91   : > { %v748_v12 = vpop.eup %747 }
  0x92   : > { %v371_v13 = vsub.f32 1.0, %v748_v12  ;;  %v372_v14 = vmax.f32 %v370_v11, 0.0 }
  0x94   : > { %v373_v17 = vmax.f32 %v371_v13, 0.0  ;;  %v374_v18 = vmul.f32 %v372_v14, %v372_v14 }
  0x96   : > { %v375_v19 = vmul.f32 %v373_v17, %v373_v17  ;;  %v376_v20 = vmul.f32 %v374_v18, %v364_v6 }
  0x98   : > { %v377_v22 = vmul.f32 %v375_v19, %v365_v7  ;;  %v378_v23 = vsub.f32 0.0, %v376_v20 }
  0x9a   : > { %v379_v24 = vsub.f32 0.0, %v377_v22 }
  0x9c   : > { %v384_v29 = vcombine.low %v378_v23, %v379_v24 }
  0x9e   : > { %v391_v30 = vrot.slane %v384_v29, %v390_v25 }
  0xa0   : > { %v398_v32 = vrot.slane %v391_v30, %v390_v25 }
  0xa2   : > { %v400_v33 = vsel %vm380_vm2, %v398_v32, 0.0 }
  0xa3   : > { %v401_v34 = vadd.f32 %v400_v33, %v381_v31 }
  0xa5   : > { %406 = vst.msk [vmem:[#allocation2] sm:$0x3] %vm1071_vm0, %v401_v34 }
  0xac   : > { %v414_v38 = vld [vmem:[#allocation2] sm:$0x3] }
  0xad   : > { %v419_v26 = vrot.slane %v414_v38, %v1091_v27  ;;  %v423_v39 = vrot.slane %v414_v38, %v1094_v28 }
  0xaf   : > { %v427_v40 = vsel %vm426_vm5, %v419_v26, 0.0  ;;  %v428_v41 = vsel %vm426_vm5, %v423_v39, 0.0 }
  0xb0   : > { %v429_v43 = vadd.f32 %v428_v41, %v427_v40 }
  0xb2   : > { %430 = vadd.xlane.f32.xlu0 %v429_v43 }
  0xb6   : > { %456 = vadd.xlane.f32.xlu0 %v455_v44 }
 0x13b   : > { %v431_v1 = vpop.xlane.xlu0 %430 }
 0x13c   : > { %v432_v45 = vrot.slane %v431_v1, 4 }
 0x13e   : > { %v433_v46 = vadd.f32 %v432_v45, %v431_v1 }
 0x13f   : > { %v457_v47 = vpop.xlane.xlu0 %456 }
 0x140   : > { %v434_v48 = vrot.slane %v433_v46, 2  ;;  %v458_v27 = vrot.slane %v457_v47, 4 }
 0x142   : > { %v459_v28 = vadd.f32 %v458_v27, %v457_v47  ;;  %v435_v49 = vadd.f32 %v434_v48, %v433_v46 }
 0x144   : > { %v460_v50 = vrot.slane %v459_v28, 2  ;;  %v436_v51 = vrot.slane %v435_v49, 1 }
 0x146   : > { %v461_v52 = vadd.f32 %v460_v50, %v459_v28  ;;  %v437_v53 = vadd.f32 %v436_v51, %v435_v49 }
 0x148   : > { %660 = vpush %v437_v53  ;;  %v462_v54 = vrot.slane %v461_v52, 1 }
 0x14a   : > { %v463_v55 = vadd.f32 %v462_v54, %v461_v52 }
 0x14c   : > { %662 = vpush %v463_v55 }
 0x179   : > { %s661_s8 = spop %660 }
 0x17a   : > { %v439_v56 = vstv %s661_s8 }
 0x17b   : > { %440 = vst [vmem:[%s264_s4] sm:$0x1] %v439_v56 }
 0x17c   : > { %818 = shalt.err (!%p815_p6)
}
 0x17d   : > { %s819_s22 = scalar_lea.hbm %s1125_s6, 16  ;;  %s823_s18 = scalar_lea.hbm %s1201_s2, 32 }
 0x17e   : > { %p820_p7 = scmp.ne.s32.totalorder %s1125_s6, %s819_s22  ;;  %p824_p4 = scmp.lt.s32.totalorder %s1125_s6, %s1201_s2 }
 0x17f   : > { %p825_p10 = scmp.lt.s32.totalorder %s823_s18, %s819_s22 }
 0x180   : > { %p821_p1 = pnand %p820_p7, %p998_p9 }
 0x181   : > { %p826_p8 = por %p825_p10, %p824_p4 }
 0x182   : > { %p822_p2 = pneg %p821_p1 }
 0x184   : > { %p827_p0 = pnand %p826_p8, %p822_p2 }
 0x186   : > { %830 = shalt.err (!%p827_p0)
}
 0x187   : > { %668 = dma.vmem_to_hbm [thread:$0]  (%p998_p9), %s1127_s5, 16, %s1125_s6, %s468_s10  }
 0x188   : > { %s663_s21 = spop %662  ;;  %s499_s9 = scalar_lea.hbm %s1202_s3, %s654_s24 }
 0x189   : > { %v465_v57 = vstv %s663_s21  ;;  %s472_s22 = scalar_lea.sflag [#allocation11], %s1057_s28  ;;  %s831_s30 = scalar_lea.vmem %s1129_s11, 16 }
 0x18a   : > { %466 = vst [vmem:[%s270_s7] sm:$0x1] %v465_v57  ;;  %p832_p3 = scmp.ne.s32.totalorder %s1129_s11, %s831_s30  ;;  %s926_s4 = smov [#allocation10]  }
 0x18b   : > { %s835_s18 = sshll.u32 %s926_s4, 4  ;;  %s836_s18 = int_to_ptr.vmem [resolvable:$false] %s835_s18 }
 0x18c   : > { %p833_p13 = pnand %p832_p3, %p998_p9  ;;  %s837_s19 = scalar_lea.vmem %s836_s18, 32 }
 0x18d   : > { %p838_p12 = scmp.lt.s32.totalorder %s1129_s11, %s836_s18  ;;  %p839_p6 = scmp.lt.s32.totalorder %s837_s19, %s831_s30 }
 0x18e   : > { %p834_p5 = pneg %p833_p13 }
 0x18f   : > { %p840_p7 = por %p839_p6, %p838_p12 }
 0x191   : > { %p841_p1 = pnand %p840_p7, %p834_p5 }
 0x193   : > { %844 = shalt.err (!%p841_p1)
}
 0x194   : > { %s845_s15 = scalar_lea.hbm %s499_s9, 16  ;;  %s849_s5 = scalar_lea.hbm %s1202_s3, 32 }
 0x195   : > { %p846_p2 = scmp.ne.s32.totalorder %s499_s9, %s845_s15  ;;  %p850_p8 = scmp.lt.s32.totalorder %s499_s9, %s1202_s3 }
 0x196   : > { %p851_p0 = scmp.lt.s32.totalorder %s849_s5, %s845_s15 }
 0x197   : > { %p847_p4 = pnand %p846_p2, %p998_p9 }
 0x198   : > { %p852_p3 = por %p851_p0, %p850_p8 }
 0x199   : > { %p848_p10 = pneg %p847_p4 }
 0x19b   : > { %p853_p13 = pnand %p852_p3, %p848_p10 }
 0x19d   : > { %856 = shalt.err (!%p853_p13)
}
 0x19e   : > { %669 = dma.vmem_to_hbm [thread:$0]  (%p998_p9), %s1129_s11, 16, %s499_s9, %s472_s22  }
 0x19f PF: > { %s513_s10 = sand.u32 1, %s899_s12   ;;  %p1211_p5 = scmp.ge.s32.totalorder %s919_s17, 2 }
 0x1a0   : > { %s514_s8 = scalar_lea.sflag [#allocation6], %s513_s10 }
 0x1a1   : > { %p680_p12 = pnand %p1211_p5, %p1005_p11 }
 0x1a3   : > { %p681_p6 = pneg %p680_p12 }
 0x1a5   : > { %890 = dma.done.wait (%p681_p6), %s514_s8, 16  }
 0x1a6   : > { %892 = vsyncadd (%p681_p6), %s514_s8, 4294967280  ;;  %s522_s21 = scalar_lea.sflag [#allocation11], %s513_s10 }
 0x1a7   : > { %894 = dma.done.wait (%p681_p6), %s522_s21, 16  }
 0x1a8   : > { %896 = vsyncadd (%p681_p6), %s522_s21, 4294967280  ;;  %s26_s17 = sadd.s32 1, %s919_s17   ;;  %s1212_s12 = smov %s903_s13 }
 0x1a9   : > { %p23_p7 = scmp.ge.s32.totalorder %s26_s17, 4   ;;  %s1213_s13 = smov %s907_s14 }
 0x1aa   : > { %s1214_s14 = smov %s1003_s26  ;;  %s1215_s15 = smov %s915_s16 }
 0x1ab   : > { %s1216_s16 = smov %s1218_s20  ;;  %25 = sbr.rel (!%p23_p7) target bundleno = 10 (0xa), region = 111 }
 0x1b0   :  { %526 = vsyncpa [#allocation5], 1 }
 0x1b1   :  { %528 = vsyncpa [#allocation5 + $0x1], 1 }
 0x1b2   :  { %529 = vsyncpa [#allocation8], 1 }
 0x1b3   :  { %531 = vsyncpa [#allocation8 + $0x1], 1 }
 0x1b4   :  { %532 = vsyncpa [#allocation6], 1 }
 0x1b5   :  { %534 = vsyncpa [#allocation6 + $0x1], 1 }
 0x1b6   :  { %535 = vsyncpa [#allocation11], 1 }
 0x1b7   :  { %537 = vsyncpa [#allocation11 + $0x1], 1 }

</bundles_post_ra>
